<compile_context>
chip_gen: v5e
topology: v5e:2x2
jax: 0.10.0
libtpu: 0.0.40
codegen_flags: <defaults>
</compile_context>

<pallas_src>
import jax
import jax.numpy as jnp
from jax.experimental import pallas as pl
from jax.experimental.pallas import tpu as pltpu

LANE = 128
SUBLANE = 8
MAX_TILE_ROWS = 2048          # (2048, 128) f32 block = 1 MiB per input
NUM_CORES = 2                 # leading "parallel" axis; serial loop on 1-TC chips


def _round_up(x, m):
    return (x + m - 1) // m * m


def _make_l1_kernel(starts, weights, tile_rows):
    """Build the fused weighted-L1-sum kernel.

    starts[i]  : flat offset in the concatenated slab where tensor i begins.
    weights[i] : 1 / (num_tensors * numel_i) -- compile-time Python floats.
    """
    block_elems = tile_rows * LANE

    def kernel(a_ref, b_ref, o_ref, acc_ref):
        j = pl.program_id(1)

        @pl.when(j == 0)
        def _init():
            acc_ref[...] = jnp.zeros_like(acc_ref)

        diff = jnp.abs(a_ref[...].astype(jnp.float32)
                       - b_ref[...].astype(jnp.float32))

        # Global flat offset of every element in this block. It selects the
        # per-tensor weight; pad-tail elements have |0-0| = 0, so whatever
        # weight they pick up contributes nothing.
        block = pl.program_id(0) * pl.num_programs(1) + j
        row = jax.lax.broadcasted_iota(jnp.int32, (tile_rows, LANE), 0)
        lane = jax.lax.broadcasted_iota(jnp.int32, (tile_rows, LANE), 1)
        offset = block * block_elems + row * LANE + lane

        w = jnp.zeros((tile_rows, LANE), jnp.float32)
        for s, wt in zip(starts, weights):   # small static unrolled loop
            w = jnp.where(offset >= s, jnp.float32(wt), w)

        # VPU-only partial reduction into a vreg-shaped accumulator
        # (no per-step XLU full reduce, no per-step masked (1,1) store).
        acc_ref[...] += (diff * w).reshape(-1, SUBLANE, LANE).sum(axis=0)

        @pl.when(j == pl.num_programs(1) - 1)
        def _finalize():
            o_ref[...] = acc_ref[...].reshape(1, SUBLANE, LANE)

    return kernel


def perception_loss(results, targets):
    """Pallas equivalent of PerceptionLoss.forward: mean of per-pair mean-L1."""
    n = len(results)
    assert n == len(targets) and n > 0
    dtype = jnp.result_type(*(list(results) + list(targets)))

    flats_a, flats_b, starts, weights = [], [], [], []
    offset = 0
    for r, t in zip(results, targets):
        assert r.shape == t.shape, "L1Loss requires matching shapes"
        numel = r.size
        flats_a.append(jnp.asarray(r, dtype).reshape(-1))
        flats_b.append(jnp.asarray(t, dtype).reshape(-1))
        starts.append(offset)
        weights.append(1.0 / (n * numel))
        offset += numel

    total = offset
    rows_needed = -(-total // LANE)
    tile_rows = max(SUBLANE, min(MAX_TILE_ROWS, _round_up(rows_needed, SUBLANE)))
    padded_rows = _round_up(rows_needed, NUM_CORES * tile_rows)
    pad = padded_rows * LANE - total

    if n == 1 and pad == 0:
        # Single pair, already slab-aligned: reshape only, no extra HBM pass.
        a_slab = flats_a[0].reshape(padded_rows, LANE)
        b_slab = flats_b[0].reshape(padded_rows, LANE)
    else:
        tail = [jnp.zeros((pad,), dtype)] if pad else []
        a_slab = jnp.concatenate(flats_a + tail).reshape(padded_rows, LANE)
        b_slab = jnp.concatenate(flats_b + tail).reshape(padded_rows, LANE)

    blocks_per_core = padded_rows // (NUM_CORES * tile_rows)
    kernel = _make_l1_kernel(tuple(starts), tuple(weights), tile_rows)

    partials = pl.pallas_call(
        kernel,
        out_shape=jax.ShapeDtypeStruct((NUM_CORES, SUBLANE, LANE), jnp.float32),
        grid_spec=pltpu.PrefetchScalarGridSpec(
            num_scalar_prefetch=0,
            grid=(NUM_CORES, blocks_per_core),
            in_specs=[
                pl.BlockSpec((tile_rows, LANE),
                             lambda c, j: (c * blocks_per_core + j, 0)),
                pl.BlockSpec((tile_rows, LANE),
                             lambda c, j: (c * blocks_per_core + j, 0)),
            ],
            out_specs=pl.BlockSpec((1, SUBLANE, LANE), lambda c, j: (c, 0, 0)),
            scratch_shapes=[pltpu.VMEM((SUBLANE, LANE), jnp.float32)],
        ),
        compiler_params=pltpu.CompilerParams(
            dimension_semantics=("parallel", "arbitrary"),
            vmem_limit_bytes=32 * 1024 * 1024,   # fits v5e/v6e/v7x scoped VMEM
        ),
    )(a_slab, b_slab)

    # Single cheap cross-lane reduce of the (NUM_CORES, 8, 128) partials.
    return jnp.sum(partials)


if __name__ == "__main__":
    key = jax.random.PRNGKey(0)
    # Small multi-scale feature-map-like inputs (NCHW, PyTorch convention).
    shapes = [(2, 4, 16, 16), (2, 8, 8, 8), (2, 16, 4, 4)]
    results, targets = [], []
    for s in shapes:
        key, k1, k2 = jax.random.split(key, 3)
        results.append(jax.random.normal(k1, s, dtype=jnp.float32))
        targets.append(jax.random.normal(k2, s, dtype=jnp.float32))

    loss = perception_loss(results, targets)
    loss = jax.block_until_ready(loss)

    # Pure-JAX reference check.
    ref = sum(jnp.mean(jnp.abs(r - t)) for r, t in zip(results, targets)) / len(results)
    assert jnp.allclose(loss, ref, rtol=1e-5, atol=1e-5), (loss, ref)

    print("KERNEL_OK")
</pallas_src>

<mosaic_0001>
module attributes {stable_mosaic.version = 11 : i64} {
  func.func @kernel(%arg0: i32, %arg1: i32, %arg2: memref<32x128xf32, #tpu.memory_space<vmem>>, %arg3: memref<32x128xf32, #tpu.memory_space<vmem>>, %arg4: memref<1x8x128xf32, #tpu.memory_space<vmem>>, %arg5: memref<8x128xf32, #tpu.memory_space<vmem>>) attributes {dimension_semantics = [#tpu.dimension_semantics<parallel>, #tpu.dimension_semantics<arbitrary>], iteration_bounds = array<i64: 2, 1>, scalar_prefetch = 0 : i64, scratch_operands = 1 : i64, tpu.core_type = #tpu.core_type<tc>, window_params = [{transform_indices = @transform_0, window_bounds = array<i64: 32, 128>}, {transform_indices = @transform_1, window_bounds = array<i64: 32, 128>}, {transform_indices = @transform_2, window_bounds = array<i64: 1, 8, 128>}]} {
    %c0_i32 = arith.constant 0 : i32
    %0 = arith.cmpi eq, %arg1, %c0_i32 : i32
    %1 = arith.extui %0 : i1 to i32
    %c0_i32_0 = arith.constant 0 : i32
    %2 = arith.cmpi ne, %1, %c0_i32_0 : i32
    scf.if %2 {
      %cst_15 = arith.constant 0.000000e+00 : f32
      %39 = vector.broadcast %cst_15 : f32 to vector<8x128xf32>
      %c0_16 = arith.constant 0 : index
      %c0_17 = arith.constant 0 : index
      %40 = vector.load %arg5[%c0_16, %c0_17] : memref<8x128xf32, #tpu.memory_space<vmem>>, vector<8x128xf32>
      tpu.vector_store %arg5[%c0_16, %c0_17], %39 {strides = array<i32>} : memref<8x128xf32, #tpu.memory_space<vmem>>, vector<8x128xf32>,
    } else {
    }
    %c0 = arith.constant 0 : index
    %c0_1 = arith.constant 0 : index
    %3 = vector.load %arg2[%c0, %c0_1] : memref<32x128xf32, #tpu.memory_space<vmem>>, vector<32x128xf32>
    %c0_2 = arith.constant 0 : index
    %c0_3 = arith.constant 0 : index
    %4 = vector.load %arg3[%c0_2, %c0_3] : memref<32x128xf32, #tpu.memory_space<vmem>>, vector<32x128xf32>
    %5 = arith.subf %3, %4 : vector<32x128xf32>
    %6 = math.absf %5 : vector<32x128xf32>
    %c1_i32 = arith.constant 1 : i32
    %7 = arith.muli %arg0, %c1_i32 : i32
    %8 = arith.addi %7, %arg1 : i32
    %9 = tpu.iota {dimensions = array<i32: 0>} : vector<32x128xi32>
    %10 = tpu.iota {dimensions = array<i32: 1>} : vector<32x128xi32>
    %c4096_i32 = arith.constant 4096 : i32
    %11 = arith.muli %8, %c4096_i32 : i32
    %c128_i32 = arith.constant 128 : i32
    %12 = vector.broadcast %c128_i32 : i32 to vector<32x128xi32>
    %13 = arith.muli %9, %12 : vector<32x128xi32>
    %14 = vector.broadcast %11 : i32 to vector<32x128xi32>
    %15 = arith.addi %14, %13 : vector<32x128xi32>
    %16 = arith.addi %15, %10 : vector<32x128xi32>
    %cst = arith.constant 0.000000e+00 : f32
    %17 = vector.broadcast %cst : f32 to vector<32x128xf32>
    %c0_i32_4 = arith.constant 0 : i32
    %18 = vector.broadcast %c0_i32_4 : i32 to vector<32x128xi32>
    %19 = arith.cmpi sge, %16, %18 : vector<32x128xi32>
    %cst_5 = arith.constant 1.62760422E-4 : f32
    %20 = vector.broadcast %cst_5 : f32 to vector<32x128xf32>
    %21 = arith.select %19, %20, %17 : vector<32x128xi1>, vector<32x128xf32>
    %c2048_i32 = arith.constant 2048 : i32
    %22 = vector.broadcast %c2048_i32 : i32 to vector<32x128xi32>
    %23 = arith.cmpi sge, %16, %22 : vector<32x128xi32>
    %cst_6 = arith.constant 3.25520843E-4 : f32
    %24 = vector.broadcast %cst_6 : f32 to vector<32x128xf32>
    %25 = arith.select %23, %24, %21 : vector<32x128xi1>, vector<32x128xf32>
    %c3072_i32 = arith.constant 3072 : i32
    %26 = vector.broadcast %c3072_i32 : i32 to vector<32x128xi32>
    %27 = arith.cmpi sge, %16, %26 : vector<32x128xi32>
    %cst_7 = arith.constant 6.51041686E-4 : f32
    %28 = vector.broadcast %cst_7 : f32 to vector<32x128xf32>
    %29 = arith.select %27, %28, %25 : vector<32x128xi1>, vector<32x128xf32>
    %c0_8 = arith.constant 0 : index
    %c0_9 = arith.constant 0 : index
    %30 = vector.load %arg5[%c0_8, %c0_9] : memref<8x128xf32, #tpu.memory_space<vmem>>, vector<8x128xf32>
    %31 = arith.mulf %6, %29 : vector<32x128xf32>
    %32 = vector.shape_cast %31 : vector<32x128xf32> to vector<4x8x128xf32>
    %cst_10 = arith.constant dense<0.000000e+00> : vector<8x128xf32>
    %33 = vector.multi_reduction <add>, %32, %cst_10 [0] : vector<4x8x128xf32> to vector<8x128xf32>
    %34 = arith.addf %30, %33 : vector<8x128xf32>
    %c0_11 = arith.constant 0 : index
    %c0_12 = arith.constant 0 : index
    %35 = vector.load %arg5[%c0_11, %c0_12] : memref<8x128xf32, #tpu.memory_space<vmem>>, vector<8x128xf32>
    tpu.vector_store %arg5[%c0_11, %c0_12], %34 {strides = array<i32>} : memref<8x128xf32, #tpu.memory_space<vmem>>, vector<8x128xf32>,
    %c0_i32_13 = arith.constant 0 : i32
    %36 = arith.cmpi eq, %arg1, %c0_i32_13 : i32
    %37 = arith.extui %36 : i1 to i32
    %c0_i32_14 = arith.constant 0 : i32
    %38 = arith.cmpi ne, %37, %c0_i32_14 : i32
    scf.if %38 {
      %c0_15 = arith.constant 0 : index
      %c0_16 = arith.constant 0 : index
      %39 = vector.load %arg5[%c0_15, %c0_16] : memref<8x128xf32, #tpu.memory_space<vmem>>, vector<8x128xf32>
      %40 = vector.shape_cast %39 : vector<8x128xf32> to vector<1x8x128xf32>
      %c0_17 = arith.constant 0 : index
      %c0_18 = arith.constant 0 : index
      %c0_19 = arith.constant 0 : index
      %41 = vector.load %arg4[%c0_17, %c0_18, %c0_19] : memref<1x8x128xf32, #tpu.memory_space<vmem>>, vector<1x8x128xf32>
      tpu.vector_store %arg4[%c0_17, %c0_18, %c0_19], %40 {strides = array<i32>} : memref<1x8x128xf32, #tpu.memory_space<vmem>>, vector<1x8x128xf32>,
    } else {
    }
    return
  }
  func.func @transform_0(%arg0: i32, %arg1: i32) -> (i32, i32) {
    %c1_i32 = arith.constant 1 : i32
    %0 = arith.muli %arg0, %c1_i32 : i32
    %1 = arith.addi %0, %arg1 : i32
    %c0_i32 = arith.constant 0 : i32
    %c0_i32_0 = arith.constant 0 : i32
    return %1, %c0_i32 : i32, i32
  }
  func.func @transform_1(%arg0: i32, %arg1: i32) -> (i32, i32) {
    %c1_i32 = arith.constant 1 : i32
    %0 = arith.muli %arg0, %c1_i32 : i32
    %1 = arith.addi %0, %arg1 : i32
    %c0_i32 = arith.constant 0 : i32
    %c0_i32_0 = arith.constant 0 : i32
    return %1, %c0_i32 : i32, i32
  }
  func.func @transform_2(%arg0: i32, %arg1: i32) -> (i32, i32, i32) {
    %c0_i32 = arith.constant 0 : i32
    %c0_i32_0 = arith.constant 0 : i32
    %c0_i32_1 = arith.constant 0 : i32
    return %arg0, %c0_i32, %c0_i32_0 : i32, i32, i32
  }
}

</mosaic_0001>

<bundles_post_ra>
// kernel: tpu_custom_call.1
= control target key start
LH: loop header
LB: loop body
LE: loop exit
PB: predicated region body
PF: predicated region fallthrough
CT: control target
= control target key end

     0   :  { %7 = vsyncpa [#allocation4], 0  ;;  %s833_s0 = inlined_call_operand.hbm [shape: f32[64,128], index: 0, kind: input, shape index: {}]   ;;  %s834_s1 = inlined_call_operand.hbm [shape: f32[64,128], index: 1, kind: input, shape index: {}]   ;;  %s835_s2 = inlined_call_operand.hbm [shape: f32[2,8,128], index: 2, kind: output, shape index: {}]  }
   0x1   :  { %9 = vsyncpa [#allocation4 + $0x1], 0 }
   0x2   :  { %10 = vsyncpa [#allocation7], 0 }
   0x3   :  { %12 = vsyncpa [#allocation7 + $0x1], 0 }
   0x4   :  { %13 = vsyncpa [#allocation5], 0 }
   0x5   :  { %15 = vsyncpa [#allocation5 + $0x1], 0  ;;  %s686_s9 = smov 0   ;;  %s688_s10 = smov 0  }
   0x6   :  { %s690_s11 = smov 0   ;;  %s692_s12 = smov 0  }
   0x7   :  { %s694_s13 = smov 0   ;;  %s696_s14 = smov 0  }
   0x8 LB: > { %s429_s15 = sadd.s32 4294967295, %s666_s14   ;;  %s430_s16 = sadd.s32 4294967294, %s666_s14   ;;  %s666_s14 = sphi %s696_s14, %s21_s14   ;;  %s662_s13 = sphi %s694_s13, %s845_s13   ;;  %s658_s12 = sphi %s692_s12, %s844_s12   ;;  %s654_s11 = sphi %s690_s11, %s843_s11   ;;  %s650_s10 = sphi %s688_s10, %s842_s10   ;;  %s646_s9 = sphi %s686_s9, %s841_s9  }
   0x9   : > { %s33_s17 = sadd.s32 1, %s662_s13  ;;  %s42_s18 = sadd.s32 1, %s654_s11 }
   0xa   : > { %p35_p0 = scmp.ge.s32.totalorder %s33_s17, 2  ;;  %p49_p1 = scmp.ne.s32.totalorder %s654_s11, %s650_s10 }
   0xb   : > { %p50_p2 = scmp.eq.s32.totalorder %s666_s14, 0  ;;  %p55_p3 = scmp.ne.s32.totalorder %s650_s10, %s646_s9 }
   0xc   : > { %s847_s17 = smov (%p35_p0, %s33_s17), 0  ;;  %p56_p5 = scmp.eq.s32.totalorder %s429_s15, 0 }
   0xd   : > { %p727_p4 = por %p50_p2, %p49_p1  ;;  %s39_s20 = ssub.s32 %s662_s13, %s847_s17 }
   0xe   : > { %p107_p6 = scmp.eq.s32.totalorder %s429_s15, 1  ;;  %p40_p7 = scmp.eq.s32.totalorder %s39_s20, 0 }
   0xf   : > { %p733_p8 = por %p56_p5, %p55_p3  ;;  %p113_p10 = scmp.eq.s32.totalorder %s430_s16, 1 }
  0x10   : > { %p737_p9 = por %p107_p6, %p49_p1  ;;  %p432_p12 = scmp.ge.s32.totalorder %s666_s14, 2 }
  0x11   : > { %s742_s23 = scalar_select %p40_p7, %s654_s11, %s42_s18  }
  0x12   : > { %p744_p11 = por %p113_p10, %p55_p3  ;;  %p467_p13 = scmp.lt.s32.totalorder %s666_s14, 2 }
  0x13   : > { %s751_s25 = sand.u32 1, %s654_s11   ;;  %s448_s27 = sshll.u32 %s662_s13, 5 }
  0x14   : > { %s433_s26 = sshll.u32 %s751_s25, 5  ;;  %s143_s30 = scalar_lea.hbm %s833_s0, %s448_s27 }
  0x15   : > { %s137_s3 = scalar_lea.vmem [#allocation3], %s433_s26  ;;  %s144_s5 = sshll.u32 %s143_s30, 4  ;;  %s145_s5 = int_to_ptr.hbm [resolvable:$true] %s144_s5 }
  0x16   : > { %s146_s4 = sshll.u32 %s137_s3, 4  ;;  %p760_p0 = pnand %p467_p13, %p727_p4  ;;  %s147_s4 = int_to_ptr.vmem [resolvable:$true] %s146_s4 }
  0x17   : > { %p439_p1 = scmp.ge.s32.totalorder %s666_s14, 1  ;;  %s134_s7 = scalar_lea.sflag [#allocation4], %s751_s25 }
  0x18   : > { %s668_s8 = smov 128   ;;  %s669_s15 = smov 8  }
  0x19   : > { %459 = dma.hbm_to_vmem [thread:$0]  (!%p760_p0), %s145_s5, 512, %s147_s4, %s134_s7, %s668_s8, %s668_s8, %s669_s15  }
  0x1a   : > { %p177_p2 = scmp.lt.s32.totalorder %s666_s14, 3  ;;  %s166_s20 = scalar_lea.hbm %s834_s1, %s448_s27 }
  0x1b   : > { %s167_s28 = sshll.u32 %s166_s20, 4  ;;  %s160_s19 = scalar_lea.vmem [#allocation6], %s433_s26  ;;  %s168_s28 = int_to_ptr.hbm [resolvable:$true] %s167_s28 }
  0x1c   : > { %p178_p3 = pnand %p439_p1, %p177_p2  ;;  %s169_s29 = sshll.u32 %s160_s19, 4  ;;  %s170_s29 = int_to_ptr.vmem [resolvable:$true] %s169_s29 }
  0x1d   : > { %s157_s30 = scalar_lea.sflag [#allocation7], %s751_s25  ;;  %s776_s3 = sand.u32 (!%p178_p3), 1, %s650_s10  }
  0x1e   : > { %462 = dma.hbm_to_vmem [thread:$0]  (!%p760_p0), %s168_s28, 512, %s170_s29, %s157_s30, %s668_s8, %s668_s8, %s669_s15  }
  0x1f   : > { %181 = sbr.rel (%p178_p3) target bundleno = 67 (0x43), region = 28  ;;  %s440_s4 = sshll.u32 (!%p178_p3), %s776_s3, 5 }
  0x20   : > { %s184_s5 = scalar_lea.sflag (!%p178_p3), [#allocation4], %s776_s3  ;;  %s187_s7 = scalar_lea.vmem (!%p178_p3), [#allocation3], %s440_s4 }
  0x24   : > { %633 = dma.done.wait (%p733_p8), %s184_s5, 512  }
  0x25   : > { %635 = vsyncadd (%p733_p8), %s184_s5, 4294966784  ;;  %s194_s25 = scalar_lea.sflag [#allocation7], %s776_s3  ;;  %s197_s26 = scalar_lea.vmem [#allocation6], %s440_s4 }
  0x26   : > { %637 = dma.done.wait (%p733_p8), %s194_s25, 512  }
  0x27   : > { %639 = vsyncadd (%p733_p8), %s194_s25, 4294966784  ;;  %v250_v0 = vlaneseq  ;;  %s443_s27 = sshll.u32 %s658_s12, 12  ;;  %v233_v12 = vld [vmem:[%s187_s7] sm:$0xff]  ;;  %v234_v13 = vld [vmem:[%s187_s7 + $0x8] sm:$0xff]  ;;  %s442_s21 = sshll.u32 %s776_s3, 3  ;;  %v670_v35 = vmov 0.0  }
  0x28   : > { %v262_v3 = vstv %s443_s27  ;;  %v235_v14 = vld [vmem:[%s187_s7 + $0x10] sm:$0xff]  ;;  %v236_v15 = vld [vmem:[%s187_s7 + $0x18] sm:$0xff]  ;;  %v237_v16 = vld [vmem:[%s197_s26] sm:$0xff]  ;;  %s445_s6 = sshll.u32 %s658_s12, 3  ;;  %s223_s18 = scalar_lea.vmem [#allocation8], %s442_s21 }
  0x29   : > { %v251_v1 = vshrl.u32 %v250_v0, 7  ;;  %v256_v2 = vand.u32 127, %v250_v0  ;;  %v238_v17 = vld [vmem:[%s197_s26 + $0x8] sm:$0xff]  ;;  %v239_v22 = vld [vmem:[%s197_s26 + $0x10] sm:$0xff]  ;;  %v240_v23 = vld [vmem:[%s197_s26 + $0x18] sm:$0xff]  ;;  %v241_v24 = vsub.f32 %v233_v12, %v237_v16  ;;  %s321_s16 = scalar_lea.hbm %s835_s2, %s445_s6  ;;  %s323_s20 = sshll.u32 %s223_s18, 4  ;;  %s324_s20 = int_to_ptr.vmem [resolvable:$true] %s323_s20 }
  0x2a   : > { %v242_v25 = vsub.f32 %v234_v13, %v238_v17  ;;  %v243_v26 = vsub.f32 %v235_v14, %v239_v22  ;;  %v244_v27 = vsub.f32 %v236_v15, %v240_v23  ;;  %s325_s28 = sshll.u32 %s321_s16, 4  ;;  %s311_s19 = scalar_lea.sflag [#allocation5], %s776_s3  ;;  %s326_s28 = int_to_ptr.hbm [resolvable:$true] %s325_s28 }
  0x2b   : > { %v252_v4 = vadd.s32 8, %v251_v1  ;;  %v253_v5 = vadd.s32 16, %v251_v1  ;;  %v254_v6 = vadd.s32 24, %v251_v1  ;;  %v258_v7 = vmul.u32 128, %v251_v1  ;;  %s594_s29 = sshra.s32 %s326_s28, 4  ;;  %s600_s5 = scalar_lea.hbm %s835_s2, 16  ;;  %s595_s29 = int_to_ptr.hbm [resolvable:$true] %s594_s29 }
  0x2c   : > { %v245_v30 = vand.u32 2147483647, %v241_v24  ;;  %v246_v31 = vand.u32 2147483647, %v242_v25  ;;  %v247_v33 = vand.u32 2147483647, %v243_v26  ;;  %p601_p7 = scmp.lt.s32.totalorder %s595_s29, %s835_s2 }
  0x2d   : > { %v259_v8 = vmul.u32 128, %v252_v4  ;;  %v260_v9 = vmul.u32 128, %v253_v5  ;;  %v261_v10 = vmul.u32 128, %v254_v6  ;;  %v263_v11 = vadd.s32 %v262_v3, %v258_v7  ;;  %s596_s12 = scalar_lea.hbm %s595_s29, 8 }
  0x2e   : > { %v248_v34 = vand.u32 2147483647, %v244_v27  ;;  %p597_p4 = scmp.ne.s32.totalorder %s595_s29, %s596_s12  ;;  %p602_p8 = scmp.lt.s32.totalorder %s600_s5, %s596_s12 }
  0x2f   : > { %v264_v18 = vadd.s32 %v262_v3, %v259_v8  ;;  %v265_v19 = vadd.s32 %v262_v3, %v260_v9  ;;  %v266_v20 = vadd.s32 %v262_v3, %v261_v10  ;;  %v267_v21 = vadd.s32 %v263_v11, %v256_v2 }
  0x30   : > { %p598_p5 = pnand %p597_p4, %p737_p9  ;;  %p603_p10 = por %p602_p8, %p601_p7 }
  0x31   : > { %v268_v28 = vadd.s32 %v264_v18, %v256_v2  ;;  %v269_v29 = vadd.s32 %v265_v19, %v256_v2  ;;  %v270_v32 = vadd.s32 %v266_v20, %v256_v2  ;;  %vm271_vm0 = vcmp.ge.s32.totalorder %v267_v21, 0 }
  0x32   : > { %v275_v36 = vsel %vm271_vm0, 0.00016276042, %v670_v35  ;;  %vm279_vm4 = vcmp.ge.s32.totalorder %v267_v21, 2048  ;;  %vm287_vm8 = vcmp.ge.s32.totalorder %v267_v21, 3072  ;;  %p599_p6 = pneg %p598_p5 }
  0x33   : > { %vm272_vm1 = vcmp.ge.s32.totalorder %v268_v28, 0  ;;  %vm273_vm2 = vcmp.ge.s32.totalorder %v269_v29, 0  ;;  %vm274_vm3 = vcmp.ge.s32.totalorder %v270_v32, 0  ;;  %vm280_vm5 = vcmp.ge.s32.totalorder %v268_v28, 2048 }
  0x34   : > { %v276_v37 = vsel %vm272_vm1, 0.00016276042, %v670_v35  ;;  %v277_v38 = vsel %vm273_vm2, 0.00016276042, %v670_v35  ;;  %v278_v39 = vsel %vm274_vm3, 0.00016276042, %v670_v35  ;;  %p604_p13 = pnand %p603_p10, %p599_p6 }
  0x35   : > { %vm281_vm6 = vcmp.ge.s32.totalorder %v269_v29, 2048  ;;  %vm282_vm7 = vcmp.ge.s32.totalorder %v270_v32, 2048  ;;  %v283_v40 = vsel %vm279_vm4, 0.00032552084, %v275_v36  ;;  %v284_v41 = vsel %vm280_vm5, 0.00032552084, %v276_v37 }
  0x36   : > { %v285_v42 = vsel %vm281_vm6, 0.00032552084, %v277_v38  ;;  %v286_v43 = vsel %vm282_vm7, 0.00032552084, %v278_v39  ;;  %vm288_vm9 = vcmp.ge.s32.totalorder %v268_v28, 3072  ;;  %vm289_vm10 = vcmp.ge.s32.totalorder %v269_v29, 3072 }
  0x37   : > { %vm290_vm11 = vcmp.ge.s32.totalorder %v270_v32, 3072  ;;  %v291_v44 = vsel %vm287_vm8, 0.0006510417, %v283_v40  ;;  %v292_v45 = vsel %vm288_vm9, 0.0006510417, %v284_v41 }
  0x38   : > { %v293_v46 = vsel %vm289_vm10, 0.0006510417, %v285_v42  ;;  %v294_v47 = vsel %vm290_vm11, 0.0006510417, %v286_v43  ;;  %v296_v48 = vmul.f32 %v291_v44, %v245_v30  ;;  %v297_v49 = vmul.f32 %v292_v45, %v246_v31 }
  0x39   : > { %v298_v50 = vmul.f32 %v293_v46, %v247_v33  ;;  %v299_v51 = vmul.f32 %v294_v47, %v248_v34 }
  0x3a   : > { %v300_v52 = vadd.f32 %v297_v49, %v296_v48 }
  0x3c   : > { %v301_v53 = vadd.f32 %v300_v52, %v298_v50 }
  0x3e   : > { %v302_v54 = vadd.f32 %v301_v53, %v299_v51 }
  0x40   : > { %309 = vst [vmem:[%s223_s18] sm:$0xff] %v302_v54 }
  0x41   : > { %607 = shalt.err (!%p604_p13)
}
  0x42   : > { %454 = dma.vmem_to_hbm [thread:$0]  (%p737_p9), %s324_s20, 128, %s326_s28, %s311_s19  }
  0x43 PF: > { %s337_s3 = sand.u32 1, %s646_s9   ;;  %p464_p0 = pnand %p432_p12, %p744_p11 }
  0x44   : > { %s338_s26 = scalar_lea.sflag [#allocation5], %s337_s3 }
  0x45   : > { %p465_p1 = pneg %p464_p0 }
  0x47   : > { %641 = dma.done.wait (%p465_p1), %s338_s26, 128  }
  0x48   : > { %643 = vsyncadd (%p465_p1), %s338_s26, 4294967168  ;;  %s21_s14 = sadd.s32 1, %s666_s14   ;;  %s841_s9 = smov %s650_s10 }
  0x49   : > { %p18_p2 = scmp.ge.s32.totalorder %s21_s14, 4   ;;  %s842_s10 = smov %s654_s11 }
  0x4a   : > { %s843_s11 = smov %s742_s23  ;;  %s844_s12 = smov %s662_s13 }
  0x4b   : > { %s845_s13 = smov %s847_s17  ;;  %20 = sbr.rel (!%p18_p2) target bundleno = 8 (0x8), region = 94 }
  0x50   :  { %344 = vsyncpa [#allocation4], 1 }
  0x51   :  { %346 = vsyncpa [#allocation4 + $0x1], 1 }
  0x52   :  { %347 = vsyncpa [#allocation7], 1 }
  0x53   :  { %349 = vsyncpa [#allocation7 + $0x1], 1 }
  0x54   :  { %350 = vsyncpa [#allocation5], 1 }
  0x55   :  { %352 = vsyncpa [#allocation5 + $0x1], 1 }

</bundles_post_ra>
